<compile_context>
chip_gen: v6e
topology: v6e:2x2x1
jax: 0.10.0
libtpu: 0.0.40
codegen_flags: <defaults>
</compile_context>

<pallas_src>
import functools

import jax
import jax.numpy as jnp
from jax.experimental import pallas as pl
from jax.experimental.pallas import tpu as pltpu


def _bce_loss_kernel(x_ref, y_ref, w_ref, o_ref, *, inv_l):
    k = pl.program_id(1)

    @pl.when(k == 0)
    def _():
        o_ref[...] = jnp.zeros_like(o_ref)

    # Cast to f32 inside the kernel (inputs stay in native dtype in HBM).
    x = x_ref[...].astype(jnp.float32)
    y = y_ref[...].astype(jnp.float32)
    w = w_ref[...].astype(jnp.float32)

    # Numerically-stable BCE-with-logits (PyTorch formulation):
    #   loss = max(x, 0) - x*y + log1p(exp(-|x|))
    loss = (jnp.maximum(x, 0.0) - x * y + jnp.log1p(jnp.exp(-jnp.abs(x)))) * w

    # Partial row sum over this L tile, accumulated in the resident output.
    o_ref[...] += jnp.sum(loss, axis=1, keepdims=True)

    @pl.when(k == pl.num_programs(1) - 1)
    def _():
        # mean over dim=1: divide by the ORIGINAL L (not mask sum, not padded L)
        o_ref[...] = o_ref[...] * jnp.float32(inv_l)


def _round_up(x, m):
    return ((x + m - 1) // m) * m


# Tile bounds: 3 inputs * 2 buffers * 256 * 1024 * 4 B = 6 MiB of VMEM,
# comfortably inside v7x's 64 MiB physical / 32 MiB default scoped VMEM
# (and trivially inside v5e/v6e's 128 MiB).
_TB_MAX = 256   # sublane (B) tile — multiple of 8
_TL_MAX = 1024  # lane (L) tile — multiple of 128


def sigmoid_bce_loss(inputs, target, mask=None):
    """Pallas implementation of SigmoidBCELoss.forward. Returns shape (B,) f32."""
    B, L = inputs.shape
    if mask is None:
        mask = jnp.ones(inputs.shape, dtype=inputs.dtype)

    # Choose tiles and pad so every block divides evenly (8,128)-aligned.
    TB = min(_round_up(B, 8), _TB_MAX)
    TL = min(_round_up(L, 128), _TL_MAX)
    Bp = _round_up(B, TB)
    Lp = _round_up(L, TL)

    def _pad(a):
        if a.shape == (Bp, Lp):
            return a
        return jnp.pad(a, ((0, Bp - B), (0, Lp - L)))

    x = _pad(inputs)          # padded logits = 0
    y = _pad(target)          # padded targets = 0
    w = _pad(mask)            # padded mask = 0  -> zero contribution

    grid = (Bp // TB, Lp // TL)
    kernel = functools.partial(_bce_loss_kernel, inv_l=1.0 / L)

    out = pl.pallas_call(
        kernel,
        out_shape=jax.ShapeDtypeStruct((Bp, 1), jnp.float32),
        grid=grid,
        in_specs=[
            pl.BlockSpec((TB, TL), lambda i, k: (i, k)),
            pl.BlockSpec((TB, TL), lambda i, k: (i, k)),
            pl.BlockSpec((TB, TL), lambda i, k: (i, k)),
        ],
        # Resident accumulator: same output block for every k.
        out_specs=pl.BlockSpec((TB, 1), lambda i, k: (i, 0)),
        compiler_params=pltpu.CompilerParams(
            dimension_semantics=("parallel", "arbitrary"),
        ),
    )(x, y, w)

    return out[:B, 0]


def _reference(inputs, target, mask):
    x = inputs.astype(jnp.float32)
    y = target.astype(jnp.float32)
    w = mask.astype(jnp.float32)
    loss = jnp.maximum(x, 0.0) - x * y + jnp.log1p(jnp.exp(-jnp.abs(x)))
    return jnp.mean(loss * w, axis=1)


if __name__ == "__main__":
    key = jax.random.PRNGKey(0)
    k1, k2 = jax.random.split(key)

    # Shapes consistent with the module's usage: (batch=2, num_labels=4)
    B, L = 2, 4
    inputs = jax.random.normal(k1, (B, L), dtype=jnp.float32)
    target = (jax.random.uniform(k2, (B, L)) > 0.5).astype(jnp.float32)
    mask = jnp.array([[1, 1, 1, 1], [1, 1, 0, 0]], dtype=jnp.float32)

    out = sigmoid_bce_loss(inputs, target, mask)
    out = jax.block_until_ready(out)

    ref = _reference(inputs, target, mask)
    assert out.shape == (B,)
    assert jnp.allclose(out, ref, atol=1e-5, rtol=1e-5)

    # Larger, tiled sanity check (multiple B and L tiles, bf16 inputs kept
    # in native dtype through the wrapper, non-tile-aligned shapes).
    B2, L2 = 300, 1500
    k3, k4, k5 = jax.random.split(k1, 3)
    x2 = jax.random.normal(k3, (B2, L2), dtype=jnp.bfloat16)
    y2 = (jax.random.uniform(k4, (B2, L2)) > 0.5).astype(jnp.bfloat16)
    w2 = (jax.random.uniform(k5, (B2, L2)) > 0.3).astype(jnp.bfloat16)

    out2 = jax.block_until_ready(sigmoid_bce_loss(x2, y2, w2))
    ref2 = _reference(x2, y2, w2)
    assert out2.shape == (B2,)
    assert jnp.allclose(out2, ref2, atol=2e-2, rtol=2e-2)

    print("KERNEL_OK")
</pallas_src>

<mosaic_0001>
module attributes {stable_mosaic.version = 11 : i64} {
  func.func @_bce_loss_kernel(%arg0: i32, %arg1: i32, %arg2: memref<8x128xf32, #tpu.memory_space<vmem>>, %arg3: memref<8x128xf32, #tpu.memory_space<vmem>>, %arg4: memref<8x128xf32, #tpu.memory_space<vmem>>, %arg5: memref<8x1xf32, #tpu.memory_space<vmem>>) attributes {dimension_semantics = [#tpu.dimension_semantics<parallel>, #tpu.dimension_semantics<arbitrary>], iteration_bounds = array<i64: 1, 1>, scalar_prefetch = 0 : i64, scratch_operands = 0 : i64, tpu.core_type = #tpu.core_type<tc>, window_params = [{transform_indices = @transform_0, window_bounds = array<i64: 8, 128>}, {transform_indices = @transform_1, window_bounds = array<i64: 8, 128>}, {transform_indices = @transform_2, window_bounds = array<i64: 8, 128>}, {transform_indices = @transform_3, window_bounds = array<i64: 8, 1>}]} {
    %c0_i32 = arith.constant 0 : i32
    %0 = arith.cmpi eq, %arg1, %c0_i32 : i32
    %1 = arith.extui %0 : i1 to i32
    %c0_i32_0 = arith.constant 0 : i32
    %2 = arith.cmpi ne, %1, %c0_i32_0 : i32
    scf.if %2 {
      %cst_14 = arith.constant 0.000000e+00 : f32
      %25 = vector.broadcast %cst_14 : f32 to vector<8x1xf32>
      %c0_15 = arith.constant 0 : index
      %c0_16 = arith.constant 0 : index
      %26 = vector.load %arg5[%c0_15, %c0_16] : memref<8x1xf32, #tpu.memory_space<vmem>>, vector<8x1xf32>
      tpu.vector_store %arg5[%c0_15, %c0_16], %25 {strides = array<i32>} : memref<8x1xf32, #tpu.memory_space<vmem>>, vector<8x1xf32>,
    } else {
    }
    %c0 = arith.constant 0 : index
    %c0_1 = arith.constant 0 : index
    %3 = vector.load %arg2[%c0, %c0_1] : memref<8x128xf32, #tpu.memory_space<vmem>>, vector<8x128xf32>
    %c0_2 = arith.constant 0 : index
    %c0_3 = arith.constant 0 : index
    %4 = vector.load %arg3[%c0_2, %c0_3] : memref<8x128xf32, #tpu.memory_space<vmem>>, vector<8x128xf32>
    %c0_4 = arith.constant 0 : index
    %c0_5 = arith.constant 0 : index
    %5 = vector.load %arg4[%c0_4, %c0_5] : memref<8x128xf32, #tpu.memory_space<vmem>>, vector<8x128xf32>
    %cst = arith.constant 0.000000e+00 : f32
    %6 = vector.broadcast %cst : f32 to vector<8x128xf32>
    %7 = arith.maximumf %3, %6 : vector<8x128xf32>
    %8 = arith.mulf %3, %4 : vector<8x128xf32>
    %9 = arith.subf %7, %8 : vector<8x128xf32>
    %10 = math.absf %3 : vector<8x128xf32>
    %cst_6 = arith.constant 0.000000e+00 : f32
    %11 = vector.broadcast %cst_6 : f32 to vector<8x128xf32>
    %12 = arith.subf %11, %10 : vector<8x128xf32>
    %13 = math.exp %12 : vector<8x128xf32>
    %14 = math.log1p %13 : vector<8x128xf32>
    %15 = arith.addf %9, %14 : vector<8x128xf32>
    %16 = arith.mulf %15, %5 : vector<8x128xf32>
    %c0_7 = arith.constant 0 : index
    %c0_8 = arith.constant 0 : index
    %17 = vector.load %arg5[%c0_7, %c0_8] : memref<8x1xf32, #tpu.memory_space<vmem>>, vector<8x1xf32>
    %cst_9 = arith.constant dense<0.000000e+00> : vector<8xf32>
    %18 = vector.multi_reduction <add>, %16, %cst_9 [1] : vector<8x128xf32> to vector<8xf32>
    %19 = vector.shape_cast %18 : vector<8xf32> to vector<8x1xf32>
    %20 = arith.addf %17, %19 : vector<8x1xf32>
    %c0_10 = arith.constant 0 : index
    %c0_11 = arith.constant 0 : index
    %21 = vector.load %arg5[%c0_10, %c0_11] : memref<8x1xf32, #tpu.memory_space<vmem>>, vector<8x1xf32>
    tpu.vector_store %arg5[%c0_10, %c0_11], %20 {strides = array<i32>} : memref<8x1xf32, #tpu.memory_space<vmem>>, vector<8x1xf32>,
    %c0_i32_12 = arith.constant 0 : i32
    %22 = arith.cmpi eq, %arg1, %c0_i32_12 : i32
    %23 = arith.extui %22 : i1 to i32
    %c0_i32_13 = arith.constant 0 : i32
    %24 = arith.cmpi ne, %23, %c0_i32_13 : i32
    scf.if %24 {
      %c0_14 = arith.constant 0 : index
      %c0_15 = arith.constant 0 : index
      %25 = vector.load %arg5[%c0_14, %c0_15] : memref<8x1xf32, #tpu.memory_space<vmem>>, vector<8x1xf32>
      %cst_16 = arith.constant 2.500000e-01 : f32
      %26 = vector.broadcast %cst_16 : f32 to vector<8x1xf32>
      %27 = arith.mulf %25, %26 : vector<8x1xf32>
      %c0_17 = arith.constant 0 : index
      %c0_18 = arith.constant 0 : index
      %28 = vector.load %arg5[%c0_17, %c0_18] : memref<8x1xf32, #tpu.memory_space<vmem>>, vector<8x1xf32>
      tpu.vector_store %arg5[%c0_17, %c0_18], %27 {strides = array<i32>} : memref<8x1xf32, #tpu.memory_space<vmem>>, vector<8x1xf32>,
    } else {
    }
    return
  }
  func.func @transform_0(%arg0: i32, %arg1: i32) -> (i32, i32) {
    %c0_i32 = arith.constant 0 : i32
    return %arg0, %arg1 : i32, i32
  }
  func.func @transform_1(%arg0: i32, %arg1: i32) -> (i32, i32) {
    %c0_i32 = arith.constant 0 : i32
    return %arg0, %arg1 : i32, i32
  }
  func.func @transform_2(%arg0: i32, %arg1: i32) -> (i32, i32) {
    %c0_i32 = arith.constant 0 : i32
    return %arg0, %arg1 : i32, i32
  }
  func.func @transform_3(%arg0: i32, %arg1: i32) -> (i32, i32) {
    %c0_i32 = arith.constant 0 : i32
    %c0_i32_0 = arith.constant 0 : i32
    return %arg0, %c0_i32 : i32, i32
  }
}

</mosaic_0001>

<bundles_post_ra>
// kernel: tpu_custom_call.1
= control target key start
LH: loop header
LB: loop body
LE: loop exit
PB: predicated region body
PF: predicated region fallthrough
CT: control target
= control target key end

     0   :  { %8 = vsyncpa [#allocation3], 0  ;;  %s217_s0 = inlined_call_operand.hbm [shape: f32[8,128], index: 0, kind: input, shape index: {}]   ;;  %s218_s1 = inlined_call_operand.hbm [shape: f32[8,128], index: 1, kind: input, shape index: {}]   ;;  %s219_s2 = inlined_call_operand.hbm [shape: f32[8,128], index: 2, kind: input, shape index: {}]   ;;  %s220_s3 = inlined_call_operand.vmem [shape: f32[8,1], index: 3, kind: output, shape index: {}]  }
   0x1   :  { %9 = vsyncpa [#allocation5], 0  ;;  %s166_s12 = smov [#allocation4]   ;;  %s167_s14 = smov [#allocation2]  }
   0x2   :  { %s26_s13 = sshll.u32 %s166_s12, 4  ;;  %s16_s15 = sshll.u32 %s167_s14, 4  ;;  %s27_s13 = int_to_ptr.vmem [resolvable:$true] %s26_s13  ;;  %s17_s15 = int_to_ptr.vmem [resolvable:$true] %s16_s15 }
   0x3   :  { %s110_s16 = scalar_lea.vmem %s27_s13, 128  ;;  %p115_p1 = scmp.lt.s32.totalorder %s27_s13, %s27_s13 }
   0x4   :  { %p111_p0 = scmp.ne.s32.totalorder %s27_s13, %s110_s16  ;;  %p116_p2 = scmp.lt.s32.totalorder %s110_s16, %s110_s16 }
   0x6   :  { %p117_p3 = por %p116_p2, %p115_p1 }
   0x8   :  { %p118_p4 = pnand %p117_p3, %p111_p0 }
   0xa   :  { %121 = shalt.err (!%p118_p4)
}
   0xb   :  { %29 = dma.hbm_to_vmem [thread:$0]  %s218_s1, 128, %s27_s13, [#allocation5]  }
   0xc   :  { %s130_s19 = scalar_lea.vmem %s17_s15, 128  ;;  %p135_p6 = scmp.lt.s32.totalorder %s17_s15, %s17_s15 }
   0xd   :  { %p131_p5 = scmp.ne.s32.totalorder %s17_s15, %s130_s19  ;;  %p136_p7 = scmp.lt.s32.totalorder %s130_s19, %s130_s19 }
   0xf   :  { %p137_p8 = por %p136_p7, %p135_p6 }
  0x11   :  { %p138_p9 = pnand %p137_p8, %p131_p5 }
  0x13   :  { %141 = shalt.err (!%p138_p9)
}
  0x14   :  { %19 = dma.hbm_to_vmem [thread:$0]  %s217_s0, 128, %s17_s15, [#allocation3]  }
  0x15   :  { %s168_s22 = smov [#allocation6]  }
  0x16   :  { %s36_s23 = sshll.u32 %s168_s22, 4  ;;  %s37_s23 = int_to_ptr.vmem [resolvable:$true] %s36_s23 }
  0x17   :  { %s150_s24 = scalar_lea.vmem %s37_s23, 128  ;;  %p155_p11 = scmp.lt.s32.totalorder %s37_s23, %s37_s23 }
  0x18   :  { %p151_p10 = scmp.ne.s32.totalorder %s37_s23, %s150_s24  ;;  %p156_p12 = scmp.lt.s32.totalorder %s150_s24, %s150_s24 }
  0x1a   :  { %p157_p13 = por %p156_p12, %p155_p11 }
  0x1c   :  { %p158_p0 = pnand %p157_p13, %p151_p10 }
  0x1e   :  { %161 = shalt.err (!%p158_p0)
}
  0x1f   :  { %39 = dma.hbm_to_vmem [thread:$0]  %s219_s2, 128, %s37_s23, [#allocation5]  }
  0x20   :  { %162 = dma.done.wait [#allocation3], 128  }
  0x21   :  { %163 = vsyncadd [#allocation3], 4294967168 }
  0x22   :  { %164 = dma.done.wait [#allocation5], 256  }
  0x23   :  { %165 = vsyncadd [#allocation5], 4294967040  ;;  %vm53_vm0 = vcmask 7168   ;;  %v169_v0 = vmov 0.0   ;;  %v55_v1 = vld [vmem:[#allocation2] sm:$0xff]  ;;  %v56_v8 = vld [vmem:[#allocation4] sm:$0xff] }
  0x24   :  { %54 = vst.msk [vmem:[%s220_s3] sm:$0xff] %vm53_vm0, %v169_v0  ;;  %v61_v2 = vand.u32 2147483647, %v55_v1  ;;  %v58_v10 = vmax.f32 %v55_v1, 0.0  ;;  %v59_v11 = vmul.f32 %v56_v8, %v55_v1  ;;  %v57_v17 = vld [vmem:[#allocation6] sm:$0xff] }
  0x26   :  { %v62_v3 = vsub.f32 0.0, %v61_v2  ;;  %v60_v15 = vsub.f32 %v58_v10, %v59_v11 }
  0x28   :  { %v63_v4 = vmul.f32 1.442695, %v62_v3 }
  0x2a   :  { %98 = vpow2.f32 %v63_v4 }
  0x2b   :  { %v76_v21 = vld [vmem:[%s220_s3] sm:$0xff] }
  0x37   :  { %v99_v5 = vpop.eup %98 }
  0x38   :  { %v65_v6 = vadd.f32 1.0, %v99_v5  ;;  %v68_v7 = vmul.f32 -0.5, %v99_v5  ;;  %v71_v12 = vand.u32 2147483647, %v99_v5 }
  0x3a   :  { %100 = vlog2.f32 %v65_v6  ;;  %v69_v9 = vadd.f32 1.0, %v68_v7  ;;  %vm72_vm1 = vcmp.lt.f32.partialorder %v71_v12, 0.0004427343 }
  0x3c   :  { %v70_v13 = vmul.f32 %v99_v5, %v69_v9 }
  0x47   :  { %v101_v14 = vpop.eup %100 }
  0x48   :  { %v67_v16 = vmul.f32 0.6931472, %v101_v14 }
  0x4a   :  { %v73_v18 = vsel %vm72_vm1, %v70_v13, %v67_v16 }
  0x4b   :  { %v74_v19 = vadd.f32 %v73_v18, %v60_v15 }
  0x4d   :  { %v75_v20 = vmul.f32 %v74_v19, %v57_v17 }
  0x4f   :  { %77 = vadd.xlane.f32.xlu0 %v75_v20 }
  0xd8   :  { %v78_v22 = vpop.xlane.xlu0 %77 }
  0xd9   :  { %v79_v23 = vadd.f32 %v78_v22, %v76_v21 }
  0xdb   :  { %81 = vst.msk [vmem:[%s220_s3] sm:$0xff] %vm53_vm0, %v79_v23 }
  0xe2   :  { %v85_v24 = vld [vmem:[%s220_s3] sm:$0xff] }
  0xe3   :  { %v86_v25 = vmul.f32 0.25, %v85_v24 }
  0xe5   :  { %87 = vst.msk [vmem:[%s220_s3] sm:$0xff] %vm53_vm0, %v86_v25 }
  0xe6   :  { %92 = vsyncpa [#allocation3], 1 }
  0xe7   :  { %93 = vsyncpa [#allocation5], 1 }

</bundles_post_ra>
